<compile_context>
chip_gen: v7x
topology: tpu7x:2x2x1
jax: 0.10.0
libtpu: 0.0.40
codegen_flags: <defaults>
</compile_context>

<pallas_src>
import functools
import numpy as np

import jax
import jax.numpy as jnp
from jax.experimental import pallas as pl
from jax.experimental.pallas import tpu as pltpu


def _patch_merging_kernel(xe_ref, xo_ref, w_ref, b_ref, o_ref, *, inv_c4, eps):
    # xe_ref / xo_ref: (block_rows, Wh, 2C)   even / odd input rows
    #   xe channels = [x0 | x2] (col-even | col-odd), xo channels = [x1 | x3]
    # w_ref: (4C, Co) reduction weight, rows ordered [x0, x2, x1, x3] and
    #        pre-scaled by the LayerNorm gamma;  b_ref: (1, Co) = beta @ W^T.
    br, wh, c2 = xe_ref.shape
    rows = br * wh

    # Load (bf16 or f32), upcast to f32 for the statistics, then collapse the
    # token axes (free relayout while (br*wh) % 8 == 0).
    xe = xe_ref[...].astype(jnp.float32).reshape(rows, c2)
    xo = xo_ref[...].astype(jnp.float32).reshape(rows, c2)

    # LayerNorm statistics over the (virtual) 4C concat [x0, x1, x2, x3].
    mu = (jnp.sum(xe, axis=-1, keepdims=True)
          + jnp.sum(xo, axis=-1, keepdims=True)) * inv_c4
    de = xe - mu
    do = xo - mu
    var = (jnp.sum(de * de, axis=-1, keepdims=True)
           + jnp.sum(do * do, axis=-1, keepdims=True)) * inv_c4
    rstd = jax.lax.rsqrt(var + eps)                 # EUP slot; no divide

    # Normalized (rows, 4C) operand; affine (gamma/beta) already folded into
    # w_ref / b_ref, so this is the only per-element VPU work left.
    ncat = jnp.concatenate([de * rstd, do * rstd], axis=-1)

    # One K=4C MXU matmul (f32 accumulation) + the precomputed bias row.
    y = jnp.dot(ncat.astype(w_ref.dtype), w_ref[...],
                preferred_element_type=jnp.float32) + b_ref[...]

    o_ref[...] = y.reshape(o_ref.shape).astype(o_ref.dtype)


def _pick_block_rows(total_rows, Wh, C2, itemsize):
    """Largest merged-row block with ~<=2 MiB of x per step, >=4 grid steps
    when possible, and (block_rows * Wh) % 8 == 0 (free in-kernel collapse)."""
    bytes_per_row = 2 * Wh * C2 * itemsize          # even + odd parity slabs
    target_rows = max(1, (2 << 20) // max(1, bytes_per_row))
    divisors = [d for d in range(1, total_rows + 1) if total_rows % d == 0]
    aligned = [d for d in divisors if (d * Wh) % 8 == 0] or divisors
    good = [d for d in aligned if d <= target_rows and total_rows // d >= 4]
    if good:
        return max(good)
    good = [d for d in aligned if d <= target_rows]
    return max(good) if good else min(aligned)


def patch_merging(x, gamma, beta, w_red, *, input_resolution, eps=1e-5,
                  block_rows=None):
    """Forward of the PyTorch PatchMerging module.

    x:      (B, H*W, C)   f32 or bf16 (bf16 halves HBM traffic)
    gamma:  (4C,)   LayerNorm weight
    beta:   (4C,)   LayerNorm bias
    w_red:  (2C, 4C) nn.Linear(4C, 2C, bias=False) weight (out, in)
    returns (B, (H/2)*(W/2), 2C) in x.dtype
    """
    H, W = input_resolution
    B, L, C = x.shape
    assert L == H * W, "input feature has wrong size"
    assert H % 2 == 0 and W % 2 == 0, f"x size ({H}*{W}) are not even."
    Hh, Wh = H // 2, W // 2
    C2, C4, Co = 2 * C, 4 * C, 2 * C
    total_rows = B * Hh
    cdt = x.dtype                                    # matmul / IO dtype

    # Free reshape: (B, H*W, C) -> (B*Hh, 2, Wh, 2C); axis 1 = row parity,
    # trailing 2C packs [col-even C | col-odd C].
    x4 = x.reshape(total_rows, 2, Wh, C2)

    # Fold the LayerNorm affine into the reduction weight (once, in f32):
    #   ((x - mu) * rstd * gamma + beta) @ W^T
    #     = ((x - mu) * rstd) @ (gamma[:, None] * W^T) + beta @ W^T
    # Rows reordered to the kernel's [xe | xo] channel order [x0, x2, x1, x3].
    wt = jnp.transpose(w_red).astype(jnp.float32)    # (4C, Co), rows [x0,x1,x2,x3]
    gw = gamma.astype(jnp.float32)[:, None] * wt     # gamma folded in
    w_cat = jnp.concatenate([gw[0:C], gw[2 * C:3 * C],
                             gw[C:2 * C], gw[3 * C:4 * C]], axis=0).astype(cdt)
    bias = (beta.astype(jnp.float32) @ wt).reshape(1, Co)   # (1, Co) f32

    if block_rows is None:
        block_rows = _pick_block_rows(total_rows, Wh, C2, x.dtype.itemsize)
    assert total_rows % block_rows == 0
    grid = (total_rows // block_rows,)

    kernel = functools.partial(_patch_merging_kernel, inv_c4=1.0 / C4, eps=eps)

    # Parity-selecting input specs: the DMA engine does the row deinterleave;
    # the size-1 parity dim is squeezed so the kernel sees a 3-D ref.
    x_spec_e = pl.BlockSpec((block_rows, None, Wh, C2), lambda i: (i, 0, 0, 0))
    x_spec_o = pl.BlockSpec((block_rows, None, Wh, C2), lambda i: (i, 1, 0, 0))
    w_spec = pl.BlockSpec((C4, Co), lambda i: (0, 0))
    b_spec = pl.BlockSpec((1, Co), lambda i: (0, 0))
    out_spec = pl.BlockSpec((block_rows, Wh, Co), lambda i: (i, 0, 0))

    # Explicit VMEM budget (double-buffered x halves + output, resident params).
    in_block = block_rows * Wh * C2 * x.dtype.itemsize
    out_block = block_rows * Wh * Co * x.dtype.itemsize
    param_bytes = C4 * Co * jnp.dtype(cdt).itemsize + Co * 4
    vmem_est = 2 * 2 * in_block + 2 * out_block + 2 * param_bytes
    vmem_limit = int(min(max(6 * vmem_est, 16 << 20), 48 << 20))

    out = pl.pallas_call(
        kernel,
        out_shape=jax.ShapeDtypeStruct((total_rows, Wh, Co), x.dtype),
        grid=grid,
        in_specs=[x_spec_e, x_spec_o, w_spec, b_spec],
        out_specs=out_spec,
        compiler_params=pltpu.CompilerParams(
            dimension_semantics=("parallel",),
            vmem_limit_bytes=vmem_limit),
    )(x4, x4, w_cat, bias)

    return out.reshape(B, Hh * Wh, Co)


def reference_patch_merging(x, gamma, beta, w_red, input_resolution, eps=1e-5):
    """Pure-JAX replica of the PyTorch module forward (math in f32)."""
    H, W = input_resolution
    B, L, C = x.shape
    xr = x.astype(jnp.float32).reshape(B, H, W, C)
    x0 = xr[:, 0::2, 0::2, :]
    x1 = xr[:, 1::2, 0::2, :]
    x2 = xr[:, 0::2, 1::2, :]
    x3 = xr[:, 1::2, 1::2, :]
    xm = jnp.concatenate([x0, x1, x2, x3], axis=-1).reshape(B, -1, 4 * C)
    mu = jnp.mean(xm, axis=-1, keepdims=True)
    var = jnp.mean(jnp.square(xm - mu), axis=-1, keepdims=True)
    xn = (xm - mu) / jnp.sqrt(var + eps) * gamma + beta
    return xn @ w_red.T


if __name__ == "__main__":
    # small, deterministic config (lane-dense: 4C = 256, 2C = 128)
    B = 2
    dim = 64
    input_resolution = (16, 16)
    H, W = input_resolution
    L = H * W

    key = jax.random.PRNGKey(0)
    k_x, k_g, k_b, k_w = jax.random.split(key, 4)

    x = jax.random.normal(k_x, (B, L, dim), dtype=jnp.float32)
    gamma = 1.0 + 0.1 * jax.random.normal(k_g, (4 * dim,), dtype=jnp.float32)
    beta = 0.05 * jax.random.normal(k_b, (4 * dim,), dtype=jnp.float32)
    w_red = 0.05 * jax.random.normal(k_w, (2 * dim, 4 * dim), dtype=jnp.float32)

    # f32 tensor path (bit-for-bit LayerNorm semantics, tight tolerance).
    out = jax.block_until_ready(
        patch_merging(x, gamma, beta, w_red, input_resolution=input_resolution))
    ref = reference_patch_merging(x, gamma, beta, w_red, input_resolution)
    np.testing.assert_allclose(np.asarray(out), np.asarray(ref),
                               rtol=2e-4, atol=2e-4)

    # bf16 tensor path (half the HBM traffic; stats/accumulation stay in f32).
    x_bf16 = x.astype(jnp.bfloat16)
    out_bf16 = jax.block_until_ready(
        patch_merging(x_bf16, gamma, beta, w_red,
                      input_resolution=input_resolution))
    ref_bf16 = reference_patch_merging(x_bf16, gamma, beta, w_red,
                                       input_resolution)
    np.testing.assert_allclose(np.asarray(out_bf16.astype(jnp.float32)),
                               np.asarray(ref_bf16),
                               rtol=5e-2, atol=5e-2)

    print("KERNEL_OK")
</pallas_src>

<mosaic_0001>
module attributes {stable_mosaic.version = 11 : i64} {
  func.func @_patch_merging_kernel(%arg0: i32, %arg1: memref<4x1x8x128xf32, #tpu.memory_space<vmem>>, %arg2: memref<4x1x8x128xf32, #tpu.memory_space<vmem>>, %arg3: memref<256x128xf32, #tpu.memory_space<vmem>>, %arg4: memref<1x128xf32, #tpu.memory_space<vmem>>, %arg5: memref<4x8x128xf32, #tpu.memory_space<vmem>>) attributes {dimension_semantics = [#tpu.dimension_semantics<parallel>], iteration_bounds = array<i64: 4>, scalar_prefetch = 0 : i64, scratch_operands = 0 : i64, tpu.core_type = #tpu.core_type<tc>, window_params = [{transform_indices = @transform_0, window_bounds = array<i64: 4, 1, 8, 128>}, {transform_indices = @transform_1, window_bounds = array<i64: 4, 1, 8, 128>}, {pipeline_mode = #tpu.pipeline_mode<synchronous>, transform_indices = @transform_2, window_bounds = array<i64: 256, 128>}, {pipeline_mode = #tpu.pipeline_mode<synchronous>, transform_indices = @transform_3, window_bounds = array<i64: 1, 128>}, {transform_indices = @transform_4, window_bounds = array<i64: 4, 8, 128>}]} {
    %c0 = arith.constant 0 : index
    %c0_0 = arith.constant 0 : index
    %c0_1 = arith.constant 0 : index
    %c0_2 = arith.constant 0 : index
    %0 = vector.load %arg1[%c0, %c0_0, %c0_1, %c0_2] : memref<4x1x8x128xf32, #tpu.memory_space<vmem>>, vector<4x1x8x128xf32>
    %1 = vector.shape_cast %0 : vector<4x1x8x128xf32> to vector<4x8x128xf32>
    %2 = vector.shape_cast %1 : vector<4x8x128xf32> to vector<32x128xf32>
    %c0_3 = arith.constant 0 : index
    %c0_4 = arith.constant 0 : index
    %c0_5 = arith.constant 0 : index
    %c0_6 = arith.constant 0 : index
    %3 = vector.load %arg2[%c0_3, %c0_4, %c0_5, %c0_6] : memref<4x1x8x128xf32, #tpu.memory_space<vmem>>, vector<4x1x8x128xf32>
    %4 = vector.shape_cast %3 : vector<4x1x8x128xf32> to vector<4x8x128xf32>
    %5 = vector.shape_cast %4 : vector<4x8x128xf32> to vector<32x128xf32>
    %cst = arith.constant dense<0.000000e+00> : vector<32xf32>
    %6 = vector.multi_reduction <add>, %2, %cst [1] : vector<32x128xf32> to vector<32xf32>
    %7 = vector.shape_cast %6 : vector<32xf32> to vector<32x1xf32>
    %cst_7 = arith.constant dense<0.000000e+00> : vector<32xf32>
    %8 = vector.multi_reduction <add>, %5, %cst_7 [1] : vector<32x128xf32> to vector<32xf32>
    %9 = vector.shape_cast %8 : vector<32xf32> to vector<32x1xf32>
    %10 = arith.addf %7, %9 : vector<32x1xf32>
    %cst_8 = arith.constant 3.906250e-03 : f32
    %11 = vector.broadcast %cst_8 : f32 to vector<32x1xf32>
    %12 = arith.mulf %10, %11 : vector<32x1xf32>
    %13 = vector.broadcast %12 : vector<32x1xf32> to vector<32x128xf32>
    %14 = arith.subf %2, %13 : vector<32x128xf32>
    %15 = vector.broadcast %12 : vector<32x1xf32> to vector<32x128xf32>
    %16 = arith.subf %5, %15 : vector<32x128xf32>
    %17 = arith.mulf %14, %14 : vector<32x128xf32>
    %cst_9 = arith.constant dense<0.000000e+00> : vector<32xf32>
    %18 = vector.multi_reduction <add>, %17, %cst_9 [1] : vector<32x128xf32> to vector<32xf32>
    %19 = vector.shape_cast %18 : vector<32xf32> to vector<32x1xf32>
    %20 = arith.mulf %16, %16 : vector<32x128xf32>
    %cst_10 = arith.constant dense<0.000000e+00> : vector<32xf32>
    %21 = vector.multi_reduction <add>, %20, %cst_10 [1] : vector<32x128xf32> to vector<32xf32>
    %22 = vector.shape_cast %21 : vector<32xf32> to vector<32x1xf32>
    %23 = arith.addf %19, %22 : vector<32x1xf32>
    %cst_11 = arith.constant 3.906250e-03 : f32
    %24 = vector.broadcast %cst_11 : f32 to vector<32x1xf32>
    %25 = arith.mulf %23, %24 : vector<32x1xf32>
    %cst_12 = arith.constant 9.99999974E-6 : f32
    %26 = vector.broadcast %cst_12 : f32 to vector<32x1xf32>
    %27 = arith.addf %25, %26 : vector<32x1xf32>
    %28 = math.rsqrt %27 : vector<32x1xf32>
    %29 = vector.broadcast %28 : vector<32x1xf32> to vector<32x128xf32>
    %30 = arith.mulf %14, %29 : vector<32x128xf32>
    %31 = vector.broadcast %28 : vector<32x1xf32> to vector<32x128xf32>
    %32 = arith.mulf %16, %31 : vector<32x128xf32>
    %33 = tpu.concatenate %30, %32 in 1 : vector<32x128xf32>, vector<32x128xf32> -> vector<32x256xf32>
    %c0_13 = arith.constant 0 : index
    %c0_14 = arith.constant 0 : index
    %34 = vector.load %arg3[%c0_13, %c0_14] : memref<256x128xf32, #tpu.memory_space<vmem>>, vector<256x128xf32>
    %cst_15 = arith.constant dense<0.000000e+00> : vector<32x128xf32>
    %35 = tpu.matmul %33, %34, %cst_15 {dimension_numbers = #tpu.dot_dimension_numbers<[1], [0], [0], [1], [0, 0, 1, 1], [], []>} : vector<32x256xf32>, vector<256x128xf32>, vector<32x128xf32> -> vector<32x128xf32>
    %c0_16 = arith.constant 0 : index
    %c0_17 = arith.constant 0 : index
    %36 = vector.load %arg4[%c0_16, %c0_17] : memref<1x128xf32, #tpu.memory_space<vmem>>, vector<1x128xf32>
    %37 = vector.broadcast %36 : vector<1x128xf32> to vector<32x128xf32>
    %38 = arith.addf %35, %37 : vector<32x128xf32>
    %39 = vector.shape_cast %38 : vector<32x128xf32> to vector<4x8x128xf32>
    %c0_18 = arith.constant 0 : index
    %c0_19 = arith.constant 0 : index
    %c0_20 = arith.constant 0 : index
    %40 = vector.load %arg5[%c0_18, %c0_19, %c0_20] : memref<4x8x128xf32, #tpu.memory_space<vmem>>, vector<4x8x128xf32>
    tpu.vector_store %arg5[%c0_18, %c0_19, %c0_20], %39 {strides = array<i32>} : memref<4x8x128xf32, #tpu.memory_space<vmem>>, vector<4x8x128xf32>,
    return
  }
  func.func @transform_0(%arg0: i32) -> (i32, i32, i32, i32) {
    %c0_i32 = arith.constant 0 : i32
    %c0_i32_0 = arith.constant 0 : i32
    %c0_i32_1 = arith.constant 0 : i32
    %c0_i32_2 = arith.constant 0 : i32
    return %arg0, %c0_i32, %c0_i32_0, %c0_i32_1 : i32, i32, i32, i32
  }
  func.func @transform_1(%arg0: i32) -> (i32, i32, i32, i32) {
    %c1_i32 = arith.constant 1 : i32
    %c0_i32 = arith.constant 0 : i32
    %c0_i32_0 = arith.constant 0 : i32
    %c0_i32_1 = arith.constant 0 : i32
    return %arg0, %c1_i32, %c0_i32, %c0_i32_0 : i32, i32, i32, i32
  }
  func.func @transform_2(%arg0: i32) -> (i32, i32) {
    %c0_i32 = arith.constant 0 : i32
    %c0_i32_0 = arith.constant 0 : i32
    %c0_i32_1 = arith.constant 0 : i32
    return %c0_i32, %c0_i32_0 : i32, i32
  }
  func.func @transform_3(%arg0: i32) -> (i32, i32) {
    %c0_i32 = arith.constant 0 : i32
    %c0_i32_0 = arith.constant 0 : i32
    %c0_i32_1 = arith.constant 0 : i32
    return %c0_i32, %c0_i32_0 : i32, i32
  }
  func.func @transform_4(%arg0: i32) -> (i32, i32, i32) {
    %c0_i32 = arith.constant 0 : i32
    %c0_i32_0 = arith.constant 0 : i32
    %c0_i32_1 = arith.constant 0 : i32
    return %arg0, %c0_i32, %c0_i32_0 : i32, i32, i32
  }
}

</mosaic_0001>

<bundles_post_ra>
// kernel: tpu_custom_call.1
= control target key start
LH: loop header
LB: loop body
LE: loop exit
PB: predicated region body
PF: predicated region fallthrough
CT: control target
= control target key end

     0   :  { %s1306_s0 = inlined_call_operand.hbm [shape: f32[16,2,8,128], index: 0, kind: input, shape index: {}]   ;;  %s1307_s1 = inlined_call_operand.hbm [shape: f32[16,2,8,128], index: 1, kind: input, shape index: {}]   ;;  %s1308_s2 = inlined_call_operand.hbm [shape: f32[256,128], index: 2, kind: input, shape index: {}]   ;;  %s1309_s3 = inlined_call_operand.vmem [shape: f32[1,128], index: 3, kind: input, shape index: {}]   ;;  %s1310_s4 = inlined_call_operand.hbm [shape: f32[16,8,128], index: 4, kind: output, shape index: {}]  }
   0x1   :  { %1316 = sst [smem:[#allocation14_spill]] %s1306_s0 }
   0x2   :  { %1317 = sst [smem:[#allocation15_spill]] %s1308_s2 }
   0x3   :  { %9 = vsyncpa [#allocation3], 0 }
   0x4   :  { %11 = vsyncpa [#allocation3 + $0x1], 0 }
   0x5   :  { %12 = vsyncpa [#allocation6], 0 }
   0x6   :  { %14 = vsyncpa [#allocation6 + $0x1], 0 }
   0x7   :  { %15 = vsyncpa [#allocation4], 0 }
   0x8   :  { %17 = vsyncpa [#allocation4 + $0x1], 0  ;;  %s1005_s15 = smov 0   ;;  %s1007_s16 = smov 0  }
   0x9   :  { %s1009_s17 = smov 0   ;;  %s1011_s18 = smov 0  }
   0xa LB: > { %s1026_s19 = sadd.s32 4294967295, %s969_s18   ;;  %s613_s20 = sadd.s32 4294967294, %s969_s18   ;;  %s969_s18 = sphi %s1011_s18, %s1341_s18   ;;  %s965_s17 = sphi %s1009_s17, %s1340_s17   ;;  %s961_s16 = sphi %s1007_s16, %s1339_s16   ;;  %s957_s15 = sphi %s1005_s15, %s1338_s15  }
   0xb   : > { %s1030_s21 = sadd.s32 1, %s969_s18   ;;  %s30_s22 = sadd.s32 1, %s965_s17 }
   0xc   : > { %s27_s23 = ssub.s32 %s969_s18, %s1030_s21  ;;  %p37_p0 = scmp.ne.s32.totalorder %s965_s17, %s961_s16 }
   0xd   : > { %p28_p1 = scmp.eq.s32.totalorder %s27_s23, 0  ;;  %p38_p2 = scmp.eq.s32.totalorder %s969_s18, 0 }
   0xe   : > { %p43_p3 = scmp.ne.s32.totalorder %s961_s16, %s957_s15  ;;  %p1311_p4 = scmp.eq.s32.totalorder %s1026_s19, 0 }
   0xf   : > { %s1042_s24 = scalar_select %p28_p1, %s965_s17, %s30_s22  }
  0x10   : > { %p1044_p5 = por %p38_p2, %p37_p0  ;;  %p1050_p6 = por %p1311_p4, %p43_p3 }
  0x11   : > { %1318 = sst [smem:[#allocation13_spill]] %s1042_s24  ;;  %p135_p7 = scmp.eq.s32.totalorder %s1026_s19, 3 }
  0x12   : > { %s1319_s25 = scalar_select %p1044_p5, 1, 0 }
  0x13   : > { %s1320_s26 = scalar_select %p1050_p6, 1, 0 }
  0x14   : > { %p141_p8 = scmp.eq.s32.totalorder %s613_s20, 3  ;;  %p614_p9 = scmp.ge.s32.totalorder %s969_s18, 1 }
  0x15   : > { %p148_p10 = scmp.lt.s32.totalorder %s969_s18, 5  ;;  %p1057_p11 = por %p135_p7, %p37_p0 }
  0x16   : > { %p1061_p12 = por %p141_p8, %p43_p3  ;;  %s971_s30 = smov [#allocation7]  }
  0x17   : > { %s1321_s27 = scalar_select %p1057_p11, 1, 0 }
  0x18   : > { %s1322_s28 = scalar_select %p1061_p12, 1, 0 }
  0x19   : > { %p1065_p13 = pnand %p614_p9, %p148_p10  ;;  %s160_s5 = sshll.u32 %s971_s30, 4  ;;  %s161_s5 = int_to_ptr.vmem [resolvable:$true] %s160_s5 }
  0x1a   : > { %s177_s7 = sand.u32 1, %s965_s17   ;;  %s1325_s2 = sld [smem:[#allocation15_spill]] }
  0x1b   : > { %s1323_s29 = scalar_select %p1065_p13, 1, 0 }
  0x1c   : > { %p741_p1 = pneg %p1065_p13 }
  0x1e   : > { %p1073_p2 = pnand %p741_p1, %p1311_p4 }
  0x20   : > { %s806_s10 = scalar_lea.hbm %s1325_s2, 4096  ;;  %p808_p7 = pneg %p1073_p2 }
  0x21   : > { %p807_p3 = scmp.ne.s32.totalorder %s1325_s2, %s806_s10  ;;  %p813_p10 = scmp.lt.u32.totalorder %s806_s10, %s1325_s2 }
  0x23   : > { %p809_p8 = pnand %p808_p7, %p807_p3 }
  0x25   : > { %p810_p9 = pneg %p809_p8 }
  0x27   : > { %p815_p1 = pnand %p813_p10, %p810_p9 }
  0x29   : > { %818 = shalt.err (!%p815_p1)
}
  0x2a   : > { %s819_s20 = scalar_lea.vmem %s161_s5, 4096  ;;  %p827_p11 = scmp.lt.s32.totalorder %s161_s5, %s161_s5 }
  0x2b   : > { %p820_p4 = scmp.ne.s32.totalorder %s161_s5, %s819_s20  ;;  %p828_p6 = scmp.lt.s32.totalorder %s819_s20, %s819_s20 }
  0x2d   : > { %p822_p0 = pnand %p820_p4, %p808_p7  ;;  %p829_p13 = por %p828_p6, %p827_p11 }
  0x2f   : > { %p823_p12 = pneg %p822_p0 }
  0x31   : > { %p830_p5 = pnand %p829_p13, %p823_p12 }
  0x33   : > { %833 = shalt.err (!%p830_p5)
}
  0x34   : > { %s972_s22 = smov 128   ;;  %s973_s23 = smov 8  }
  0x35   : > { %744 = dma.hbm_to_vmem [thread:$0]  (!%p1073_p2), %s1325_s2, 4096, %s161_s5, [#allocation6], %s972_s22, %s972_s22, %s973_s23  }
  0x36   : > { %p1326_p4 = scmp.ne.s32.totalorder %s1319_s25, 0  ;;  %p1327_p0 = scmp.lt.s32.totalorder %s969_s18, 4 }
  0x37   : > { %s1106_s10 = sshll.u32 %s177_s7, 5  ;;  %s1315_s11 = sshll.u32 %s969_s18, 10 }
  0x38   : > { %p1102_p6 = pnand %p1327_p0, %p1326_p4  ;;  %s1329_s0 = sld [smem:[#allocation14_spill]] }
  0x39   : > { %s181_s25 = scalar_lea.vmem [#allocation2], %s1106_s10  ;;  %s1119_s14 = scalar_lea.sflag [#allocation3], %s177_s7 }
  0x3a   : > { %s189_s5 = sshll.u32 %s181_s25, 4  ;;  %p836_p11 = pneg %p1102_p6  ;;  %s1117_s5 = int_to_ptr.vmem [resolvable:$true] %s189_s5 }
  0x3e   : > { %s1114_s13 = scalar_lea.hbm %s1329_s0, %s1315_s11  ;;  %s839_s6 = scalar_lea.hbm %s1329_s0, 4096 }
  0x3f   : > { %s834_s20 = scalar_lea.hbm %s1114_s13, 512  ;;  %p840_p2 = scmp.lt.u32.totalorder %s1114_s13, %s1329_s0 }
  0x40   : > { %p835_p5 = scmp.ne.s32.totalorder %s1114_s13, %s834_s20  ;;  %p841_p3 = scmp.lt.u32.totalorder %s839_s6, %s834_s20 }
  0x41   : > { %p843_p8 = scmp.lt.u32.totalorder %s834_s20, %s1114_s13 }
  0x42   : > { %p837_p12 = pnand %p836_p11, %p835_p5  ;;  %p842_p7 = por %p841_p3, %p840_p2 }
  0x44   : > { %p838_p13 = pneg %p837_p12  ;;  %p844_p9 = por %p843_p8, %p842_p7 }
  0x46   : > { %p845_p10 = pnand %p844_p9, %p838_p13 }
  0x48   : > { %848 = shalt.err (!%p845_p10)
}
  0x49   : > { %s849_s7 = scalar_lea.vmem %s1117_s5, 512  ;;  %s974_s25 = smov [#allocation2]  }
  0x4a   : > { %p850_p1 = scmp.ne.s32.totalorder %s1117_s5, %s849_s7  ;;  %s854_s30 = sshll.u32 %s974_s25, 4  ;;  %s855_s30 = int_to_ptr.vmem [resolvable:$false] %s854_s30 }
  0x4b   : > { %s856_s11 = scalar_lea.vmem %s855_s30, 1024  ;;  %p857_p5 = scmp.lt.s32.totalorder %s1117_s5, %s855_s30 }
  0x4c   : > { %p852_p4 = pnand %p850_p1, %p836_p11  ;;  %p858_p12 = scmp.lt.s32.totalorder %s856_s11, %s849_s7 }
  0x4e   : > { %p853_p0 = pneg %p852_p4  ;;  %p859_p2 = por %p858_p12, %p857_p5 }
  0x50   : > { %p860_p3 = pnand %p859_p2, %p853_p0 }
  0x52   : > { %863 = shalt.err (!%p860_p3)
}
  0x53   : > { %s975_s20 = smov 256   ;;  %s1330_s8 = sshll.u32 %s969_s18, 10 }
  0x54   : > { %748 = dma.hbm_to_vmem [thread:$0]  (!%p1102_p6), %s1114_s13, 512, %s1117_s5, %s1119_s14, %s975_s20, %s972_s22, %s973_s23  }
  0x55   : > { %s546_s7 = scalar_lea.hbm %s1307_s1, %s1330_s8  ;;  %s203_s25 = scalar_lea.vmem [#allocation5], %s1106_s10 }
  0x56   : > { %s212_s30 = sshll.u32 %s203_s25, 4  ;;  %s1156_s11 = scalar_lea.hbm %s546_s7, 128  ;;  %s1158_s30 = int_to_ptr.vmem [resolvable:$true] %s212_s30 }
  0x57   : > { %s199_s0 = sand.u32 1, %s969_s18   ;;  %s894_s24 = scalar_lea.hbm %s546_s7, 640 }
  0x58   : > { %s1161_s2 = scalar_lea.sflag [#allocation6], %s199_s0  ;;  %p865_p13 = scmp.ne.s32.totalorder %s1156_s11, %s894_s24 }
  0x59   : > { %s869_s10 = scalar_lea.hbm %s1307_s1, 4096  ;;  %p870_p9 = scmp.lt.u32.totalorder %s1156_s11, %s1307_s1 }
  0x5a   : > { %p867_p7 = pnand %p865_p13, %p836_p11  ;;  %p871_p10 = scmp.lt.u32.totalorder %s869_s10, %s894_s24 }
  0x5b   : > { %p873_p4 = scmp.lt.u32.totalorder %s894_s24, %s1156_s11 }
  0x5c   : > { %p868_p8 = pneg %p867_p7  ;;  %p872_p1 = por %p871_p10, %p870_p9 }
  0x5e   : > { %p874_p0 = por %p873_p4, %p872_p1 }
  0x60   : > { %p875_p5 = pnand %p874_p0, %p868_p8 }
  0x62   : > { %878 = shalt.err (!%p875_p5)
}
  0x63   : > { %s879_s0 = scalar_lea.vmem %s1158_s30, 512  ;;  %s976_s6 = smov [#allocation5]  }
  0x64   : > { %p880_p12 = scmp.ne.s32.totalorder %s1158_s30, %s879_s0  ;;  %s884_s12 = sshll.u32 %s976_s6, 4  ;;  %s885_s12 = int_to_ptr.vmem [resolvable:$false] %s884_s12 }
  0x65   : > { %s886_s7 = scalar_lea.vmem %s885_s12, 1024  ;;  %p887_p13 = scmp.lt.s32.totalorder %s1158_s30, %s885_s12 }
  0x66   : > { %p882_p2 = pnand %p880_p12, %p836_p11  ;;  %p888_p7 = scmp.lt.s32.totalorder %s886_s7, %s879_s0 }
  0x68   : > { %p883_p3 = pneg %p882_p2  ;;  %p889_p9 = por %p888_p7, %p887_p13 }
  0x6a   : > { %p890_p10 = pnand %p889_p9, %p883_p3 }
  0x6c   : > { %893 = shalt.err (!%p890_p10)
}
  0x6d   : > { %751 = dma.hbm_to_vmem [thread:$0]  (!%p1102_p6), %s1156_s11, 512, %s1158_s30, %s1161_s2, %s975_s20, %s972_s22, %s973_s23  }
  0x6e   : > { %p1331_p11 = scmp.ne.s32.totalorder %s1323_s29, 0 }
  0x6f   : > { %s1192_s24 = sand.u32 (!%p1331_p11), 1, %s961_s16   ;;  %p1332_p8 = scmp.ne.s32.totalorder (!%p1331_p11), %s1320_s26, 0 }
  0x70   : > { %224 = sbr.rel (%p1331_p11) target bundleno = 689 (0x2b1), region = 36  ;;  %s1195_s25 = sshll.u32 (!%p1331_p11), %s1192_s24, 5 }
  0x71   : > { %s227_s9 = scalar_lea.sflag (!%p1331_p11), [#allocation3], %s1192_s24  ;;  %s230_s13 = scalar_lea.vmem (!%p1331_p11), [#allocation2], %s1195_s25 }
  0x77   : > { %940 = dma.done.wait (%p1332_p8), %s227_s9, 512  }
  0x78   : > { %942 = vsyncadd (%p1332_p8), %s227_s9, 4294966784  ;;  %s235_s2 = sand.u32 1, %s1026_s19   ;;  %s239_s22 = scalar_lea.vmem [#allocation5], %s1195_s25 }
  0x79   : > { %s236_s29 = scalar_lea.sflag [#allocation6], %s235_s2 }
  0x7a   : > { %944 = dma.done.wait (%p1332_p8), %s236_s29, 512  }
  0x7b   : > { %946 = vsyncadd (%p1332_p8), %s236_s29, 4294966784  ;;  %p1333_p6 = scmp.eq.s32.totalorder %s1026_s19, 0 }
  0x7d   : > { %948 = dma.done.wait (%p1333_p6), [#allocation6], 4096   ;;  %p1334_p1 = pmov %p1333_p6 }
  0x7e   : > { %v280_v0 = vld [vmem:[%s239_s22] sm:$0xff]  ;;  %v282_v2 = vld [vmem:[%s239_s22 + $0x10] sm:$0xff]  ;;  %v279_v4 = vld [vmem:[%s230_s13 + $0x18] sm:$0xff]  ;;  %s272_s20 = scalar_lea.vmem [#allocation8], %s1195_s25  ;;  %s638_s11 = sshll.u32 %s1026_s19, 9 }
  0x7f   : > { %950 = vsyncadd (%p1334_p1), [#allocation6], 4294963200  ;;  %v276_v1 = vld [vmem:[%s230_s13] sm:$0xff]  ;;  %292 = vadd.xlane.f32.xlu1 %v280_v0  ;;  %v278_v3 = vld [vmem:[%s230_s13 + $0x10] sm:$0xff]  ;;  %s506_s30 = sshll.u32 %s272_s20, 4  ;;  %s1263_s14 = scalar_lea.hbm %s1310_s4, %s638_s11  ;;  %s1258_s30 = int_to_ptr.vmem [resolvable:$true] %s506_s30 }
  0x80   : > { %284 = vadd.xlane.f32.xlu0 %v276_v1  ;;  %v277_v5 = vld [vmem:[%s230_s13 + $0x8] sm:$0xff]  ;;  %v283_v6 = vld [vmem:[%s239_s22 + $0x18] sm:$0xff]  ;;  %v380_v8 = vld [vmem:[#allocation7 + $0x80] sm:$0xff]  ;;  %s493_s8 = scalar_lea.sflag [#allocation4], %s1192_s24  ;;  %s895_s0 = scalar_lea.vmem %s1258_s30, 512 }
  0x81   : > { %v281_v7 = vld [vmem:[%s239_s22 + $0x8] sm:$0xff]  ;;  %v364_v10 = vld [vmem:[#allocation7] sm:$0xff]  ;;  %v382_v13 = vld [vmem:[#allocation7 + $0x90] sm:$0xff]  ;;  %p896_p4 = scmp.ne.s32.totalorder %s1258_s30, %s895_s0  ;;  %p1335_p0 = scmp.ne.s32.totalorder %s1321_s27, 0 }
  0x82   : > { %v381_v9 = vld [vmem:[#allocation7 + $0x88] sm:$0xff]  ;;  %v383_v14 = vld [vmem:[#allocation7 + $0x98] sm:$0xff]  ;;  %v366_v17 = vld [vmem:[#allocation7 + $0x10] sm:$0xff]  ;;  %s977_s19 = smov [#allocation8]  }
  0x83   : > { %296 = vadd.xlane.f32.xlu1 %v282_v2  ;;  %v683_v11 = vpack.c.bf16 %v381_v9, %v380_v8  ;;  %v365_v12 = vld [vmem:[#allocation7 + $0x8] sm:$0xff]  ;;  %v687_v16 = vpack.c.bf16 %v383_v14, %v382_v13  ;;  %v367_v18 = vld [vmem:[#allocation7 + $0x18] sm:$0xff]  ;;  %v384_v50 = vld [vmem:[#allocation7 + $0xa0] sm:$0xff]  ;;  %p897_p5 = pnand %p896_p4, %p1335_p0  ;;  %s899_s6 = sshll.u32 %s977_s19, 4  ;;  %s900_s6 = int_to_ptr.vmem [resolvable:$false] %s899_s6 }
  0x84   : > { %288 = vadd.xlane.f32.xlu0 %v278_v3  ;;  %v685_v15 = vpack.c.bf16 %v365_v12, %v364_v10  ;;  %v689_v19 = vpack.c.bf16 %v367_v18, %v366_v17  ;;  %v385_v51 = vld [vmem:[#allocation7 + $0xa8] sm:$0xff]  ;;  %v368_v53 = vld [vmem:[#allocation7 + $0x20] sm:$0xff]  ;;  %v386_v58 = vld [vmem:[#allocation7 + $0xb0] sm:$0xff]  ;;  %s901_s12 = scalar_lea.vmem %s900_s6, 1024  ;;  %p902_p2 = scmp.lt.s32.totalorder %s1258_s30, %s900_s6 }
  0x85   : > { %684 = vmatprep.subr.bf16.mxu0 %v683_v11  ;;  %715 = vmatprep.subr.bf16.mxu1 %v683_v11  ;;  %v691_v52 = vpack.c.bf16 %v385_v51, %v384_v50  ;;  %v369_v54 = vld [vmem:[#allocation7 + $0x28] sm:$0xff]  ;;  %v387_v59 = vld [vmem:[#allocation7 + $0xb8] sm:$0xff]  ;;  %v370_v61 = vld [vmem:[#allocation7 + $0x30] sm:$0xff]  ;;  %p898_p12 = pneg %p897_p5  ;;  %p903_p3 = scmp.lt.s32.totalorder %s901_s12, %s895_s0 }
  0x86   : > { %686 = vmatpush3.bf16.msra.mxu0 %v685_v15  ;;  %723 = vmatpush3.bf16.msra.mxu1 %v685_v15  ;;  %v693_v55 = vpack.c.bf16 %v369_v54, %v368_v53  ;;  %v695_v60 = vpack.c.bf16 %v387_v59, %v386_v58  ;;  %v371_v62 = vld [vmem:[#allocation7 + $0x38] sm:$0xff]  ;;  %v374_v9 = vld [vmem:[#allocation7 + $0x50] sm:$0xff]  ;;  %v392_v12 = vld [vmem:[#allocation7 + $0xe0] sm:$0xff] }
  0x87   : > { %290 = vadd.xlane.f32.xlu1 %v279_v4  ;;  %688 = vmatprep.subr.bf16.mxu0 %v687_v16  ;;  %v697_v63 = vpack.c.bf16 %v371_v62, %v370_v61  ;;  %v375_v10 = vld [vmem:[#allocation7 + $0x58] sm:$0xff]  ;;  %v393_v13 = vld [vmem:[#allocation7 + $0xe8] sm:$0xff]  ;;  %v376_v15 = vld [vmem:[#allocation7 + $0x60] sm:$0xff]  ;;  %p904_p13 = por %p903_p3, %p902_p2 }
  0x88   : > { %286 = vadd.xlane.f32.xlu0 %v277_v5  ;;  %716 = vmatprep.subr.bf16.mxu1 %v687_v16  ;;  %v705_v11 = vpack.c.bf16 %v375_v10, %v374_v9  ;;  %v707_v14 = vpack.c.bf16 %v393_v13, %v392_v12  ;;  %v377_v16 = vld [vmem:[#allocation7 + $0x68] sm:$0xff]  ;;  %v394_v18 = vld [vmem:[#allocation7 + $0xf0] sm:$0xff] }
  0x89   : > { %v709_v17 = vpack.c.bf16 %v377_v16, %v376_v15  ;;  %p905_p7 = pnand %p904_p13, %p898_p12 }
  0x8a   : > { %690 = vmatpush3.bf16.msra.mxu0 %v689_v19  ;;  %724 = vmatpush3.bf16.msra.mxu1 %v689_v19  ;;  %v395_v19 = vld [vmem:[#allocation7 + $0xf8] sm:$0xff] }
  0x8b   : > { %298 = vadd.xlane.f32.xlu1 %v283_v6  ;;  %692 = vmatprep.subr.bf16.mxu0 %v691_v52 }
  0x8c   : > { %294 = vadd.xlane.f32.xlu0 %v281_v7  ;;  %717 = vmatprep.subr.bf16.mxu1 %v691_v52 }
  0x8e   : > { %694 = vmatpush3.bf16.msra.mxu0 %v693_v55  ;;  %725 = vmatpush3.bf16.msra.mxu1 %v693_v55 }
  0x8f   : > { %696 = vmatprep.subr.bf16.mxu0 %v695_v60  ;;  %718 = vmatprep.subr.bf16.mxu1 %v695_v60 }
  0x92   : > { %698 = vmatpush3.bf16.msra.mxu0 %v697_v63  ;;  %726 = vmatpush3.bf16.msra.mxu1 %v697_v63 }
 0x10c   : > { %v293_v20 = vpop.xlane.xlu1 %292 }
 0x10d   : > { %v285_v21 = vpop.xlane.xlu0 %284 }
 0x10e   : > { %v300_v22 = vadd.f32 %v293_v20, %v285_v21  ;;  %v711_v20 = vpack.c.bf16 %v395_v19, %v394_v18  ;;  %v378_v21 = vld [vmem:[#allocation7 + $0x70] sm:$0xff] }
 0x110   : > { %v304_v23 = vmul.f32 0.00390625, %v300_v22  ;;  %v297_v24 = vpop.xlane.xlu1 %296  ;;  %v379_v22 = vld [vmem:[#allocation7 + $0x78] sm:$0xff] }
 0x111   : > { %v289_v25 = vpop.xlane.xlu0 %288 }
 0x112   : > { %v1213_v26 = vsub.f32 %v276_v1, %v304_v23  ;;  %v302_v27 = vadd.f32 %v297_v24, %v289_v25  ;;  %v1215_v28 = vsub.f32 %v280_v0, %v304_v23  ;;  %v388_v0 = vld [vmem:[#allocation7 + $0xc0] sm:$0xff]  ;;  %v389_v1 = vld [vmem:[#allocation7 + $0xc8] sm:$0xff]  ;;  %v713_v23 = vpack.c.bf16 %v379_v22, %v378_v21 }
 0x114   : > { %v306_v29 = vmul.f32 0.00390625, %v302_v27  ;;  %v316_v30 = vmul.f32 %v1213_v26, %v1213_v26  ;;  %v291_v31 = vpop.xlane.xlu1 %290  ;;  %v328_v35 = vmul.f32 %v1215_v28, %v1215_v28 }
 0x115   : > { %v287_v32 = vpop.xlane.xlu0 %286 }
 0x116   : > { %v1219_v33 = vsub.f32 %v278_v3, %v306_v29  ;;  %320 = vadd.xlane.f32.xlu0 %v316_v30  ;;  %v1221_v34 = vsub.f32 %v282_v2, %v306_v29  ;;  %v699_v2 = vpack.c.bf16 %v389_v1, %v388_v0  ;;  %v372_v3 = vld [vmem:[#allocation7 + $0x40] sm:$0xff] }
 0x118   : > { %v318_v36 = vmul.f32 %v1219_v33, %v1219_v33  ;;  %v299_v37 = vpop.xlane.xlu1 %298  ;;  %v330_v43 = vmul.f32 %v1221_v34, %v1221_v34  ;;  %700 = vmatprep.subr.bf16.mxu0 %v699_v2  ;;  %719 = vmatprep.subr.bf16.mxu1 %v699_v2 }
 0x119   : > { %v295_v38 = vpop.xlane.xlu0 %294  ;;  %v303_v39 = vadd.f32 %v299_v37, %v291_v31 }
 0x11a   : > { %v301_v40 = vadd.f32 %v295_v38, %v287_v32  ;;  %332 = vadd.xlane.f32.xlu0 %v328_v35  ;;  %324 = vadd.xlane.f32.xlu1 %v318_v36 }
 0x11b   : > { %v307_v41 = vmul.f32 0.00390625, %v303_v39 }
 0x11c   : > { %v305_v42 = vmul.f32 0.00390625, %v301_v40 }
 0x11d   : > { %v1229_v44 = vsub.f32 %v279_v4, %v307_v41  ;;  %v1233_v46 = vsub.f32 %v283_v6, %v307_v41  ;;  %v373_v4 = vld [vmem:[#allocation7 + $0x48] sm:$0xff]  ;;  %v390_v6 = vld [vmem:[#allocation7 + $0xd0] sm:$0xff] }
 0x11e   : > { %v1231_v45 = vsub.f32 %v277_v5, %v305_v42  ;;  %336 = vadd.xlane.f32.xlu1 %v330_v43  ;;  %v1235_v47 = vsub.f32 %v281_v7, %v305_v42  ;;  %v701_v5 = vpack.c.bf16 %v373_v4, %v372_v3  ;;  %v391_v7 = vld [vmem:[#allocation7 + $0xd8] sm:$0xff] }
 0x11f   : > { %v319_v48 = vmul.f32 %v1229_v44, %v1229_v44  ;;  %v331_v56 = vmul.f32 %v1233_v46, %v1233_v46  ;;  %v703_v8 = vpack.c.bf16 %v391_v7, %v390_v6 }
 0x120   : > { %v317_v49 = vmul.f32 %v1231_v45, %v1231_v45  ;;  %v329_v57 = vmul.f32 %v1235_v47, %v1235_v47  ;;  %702 = vmatpush3.bf16.msra.mxu0 %v701_v5  ;;  %727 = vmatpush3.bf16.msra.mxu1 %v701_v5 }
 0x121   : > { %704 = vmatprep.subr.bf16.mxu0 %v703_v8  ;;  %720 = vmatprep.subr.bf16.mxu1 %v703_v8 }
 0x122   : > { %326 = vadd.xlane.f32.xlu1 %v319_v48  ;;  %322 = vadd.xlane.f32.xlu0 %v317_v49 }
 0x124   : > { %706 = vmatpush3.bf16.msra.mxu0 %v705_v11  ;;  %728 = vmatpush3.bf16.msra.mxu1 %v705_v11 }
 0x125   : > { %708 = vmatprep.subr.bf16.mxu0 %v707_v14  ;;  %721 = vmatprep.subr.bf16.mxu1 %v707_v14 }
 0x126   : > { %338 = vadd.xlane.f32.xlu1 %v331_v56  ;;  %334 = vadd.xlane.f32.xlu0 %v329_v57 }
 0x128   : > { %710 = vmatpush3.bf16.msra.mxu0 %v709_v17  ;;  %729 = vmatpush3.bf16.msra.mxu1 %v709_v17 }
 0x129   : > { %712 = vmatprep.subr.bf16.mxu0 %v711_v20  ;;  %722 = vmatprep.subr.bf16.mxu1 %v711_v20 }
 0x12c   : > { %714 = vmatpush3.bf16.msra.mxu0 %v713_v23  ;;  %730 = vmatpush3.bf16.msra.mxu1 %v713_v23 }
 0x1a3   : > { %v321_v24 = vpop.xlane.xlu0 %320 }
 0x1a7   : > { %v325_v25 = vpop.xlane.xlu1 %324  ;;  %v333_v27 = vpop.xlane.xlu0 %332 }
 0x1a8   : > { %v340_v29 = vadd.f32 %v333_v27, %v321_v24 }
 0x1aa   : > { %v344_v30 = vmul.f32 0.00390625, %v340_v29 }
 0x1ab   : > { %v337_v31 = vpop.xlane.xlu1 %336 }
 0x1ac   : > { %v348_v32 = vadd.f32 1e-05, %v344_v30  ;;  %v342_v35 = vadd.f32 %v337_v31, %v325_v25 }
 0x1ae   : > { %798 = vrsqrt.f32 %v348_v32  ;;  %v346_v36 = vmul.f32 0.00390625, %v342_v35 }
 0x1af   : > { %v327_v37 = vpop.xlane.xlu1 %326  ;;  %v323_v38 = vpop.xlane.xlu0 %322 }
 0x1b0   : > { %v350_v39 = vadd.f32 1e-05, %v346_v36 }
 0x1b2   : > { %800 = vrsqrt.f32 %v350_v39 }
 0x1b3   : > { %v339_v40 = vpop.xlane.xlu1 %338  ;;  %v335_v41 = vpop.xlane.xlu0 %334 }
 0x1b4   : > { %v343_v42 = vadd.f32 %v339_v40, %v327_v37  ;;  %v341_v43 = vadd.f32 %v335_v41, %v323_v38 }
 0x1b6   : > { %v347_v48 = vmul.f32 0.00390625, %v343_v42  ;;  %v345_v49 = vmul.f32 0.00390625, %v341_v43 }
 0x1b8   : > { %v799_v50 = vpop.eup %798  ;;  %v351_v51 = vadd.f32 1e-05, %v347_v48  ;;  %v349_v52 = vadd.f32 1e-05, %v345_v49 }
 0x1b9   : > { %v360_v53 = vmul.f32 %v799_v50, %v1215_v28  ;;  %v356_v54 = vmul.f32 %v799_v50, %v1213_v26 }
 0x1ba   : > { %802 = vrsqrt.f32 %v351_v51 }
 0x1bb   : > { %804 = vrsqrt.f32 %v349_v52  ;;  %467 = vmatprep.mubr.f32.mxu0 %v360_v53 }
 0x1bc   : > { %v801_v55 = vpop.eup %800  ;;  %468 = vmatmul.mubr.f32.vlgmr.msra.gmra.mrb[0].mxu0 %v356_v54 }
 0x1bd   : > { %v362_v56 = vmul.f32 %v801_v55, %v1221_v34  ;;  %v358_v57 = vmul.f32 %v801_v55, %v1219_v33  ;;  %v629_v33 = vld [vmem:[%s1309_s3] ss:$0 sm:$0xff] }
 0x1bf   : > { %477 = vmatprep.mubr.f32.mxu1 %v362_v56 }
 0x1c0   : > { %478 = vmatmul.mubr.f32.vlgmr.msra.gmra.mrb[0].mxu1 %v358_v57 }
 0x1c4   : > { %v803_v58 = vpop.eup %802 }
 0x1c5   : > { %v805_v59 = vpop.eup %804  ;;  %v363_v60 = vmul.f32 %v803_v58, %v1233_v46  ;;  %v359_v28 = vmul.f32 %v803_v58, %v1229_v44 }
 0x1c6   : > { %v361_v26 = vmul.f32 %v805_v59, %v1235_v47  ;;  %v357_v61 = vmul.f32 %v805_v59, %v1231_v45 }
 0x1c7   : > { %482 = vmatprep.mubr.f32.mxu1 %v363_v60 }
 0x1c8   : > { %472 = vmatprep.mubr.f32.mxu0 %v361_v26  ;;  %483 = vmatmul.mubr.f32.gmra.mrb[2].mxu1 %v359_v28 }
 0x1c9   : > { %473 = vmatmul.mubr.f32.gmra.mrb[2].mxu0 %v357_v61 }
 0x28f   : > { %v671_v34 = vpop.f32.mrb[0].mxu0 }
 0x290   : > { %v672_v62 = vpop.f32.mrb[1].mxu0 }
 0x291   : > { %v673_v63 = vadd.f32 %v672_v62, %v671_v34 }
 0x293   : > { %v470_v0 = vadd.f32 %v673_v63, %v629_v33  ;;  %v677_v46 = vpop.f32.mrb[0].mxu1 }
 0x294   : > { %v678_v1 = vpop.f32.mrb[1].mxu1 }
 0x295   : > { %488 = vst [vmem:[%s272_s20] sm:$0xff] %v470_v0  ;;  %v679_v44 = vadd.f32 %v678_v1, %v677_v46 }
 0x297   : > { %v480_v47 = vadd.f32 %v679_v44, %v629_v33 }
 0x299   : > { %490 = vst [vmem:[%s272_s20 + $0x10] sm:$0xff] %v480_v47 }
 0x29b   : > { %v680_v45 = vpop.f32.mrb[2].mxu1 }
 0x29c   : > { %v674_v2 = vpop.f32.mrb[2].mxu0  ;;  %v681_v3 = vpop.f32.mrb[3].mxu1 }
 0x29d   : > { %v675_v4 = vpop.f32.mrb[3].mxu0  ;;  %v682_v5 = vadd.f32 %v681_v3, %v680_v45 }
 0x29e   : > { %v676_v6 = vadd.f32 %v675_v4, %v674_v2 }
 0x29f   : > { %v485_v7 = vadd.f32 %v682_v5, %v629_v33 }
 0x2a0   : > { %v475_v8 = vadd.f32 %v676_v6, %v629_v33 }
 0x2a1   : > { %491 = vst [vmem:[%s272_s20 + $0x18] sm:$0xff] %v485_v7 }
 0x2a2   : > { %489 = vst [vmem:[%s272_s20 + $0x8] sm:$0xff] %v475_v8 }
 0x2a3   : > { %908 = shalt.err (!%p905_p7)
}
 0x2a4   : > { %s909_s7 = scalar_lea.hbm %s1263_s14, 512  ;;  %s913_s13 = scalar_lea.hbm %s1310_s4, 2048 }
 0x2a5   : > { %p910_p9 = scmp.ne.s32.totalorder %s1263_s14, %s909_s7  ;;  %p914_p8 = scmp.lt.u32.totalorder %s1263_s14, %s1310_s4 }
 0x2a6   : > { %p915_p6 = scmp.lt.u32.totalorder %s913_s13, %s909_s7  ;;  %p917_p4 = scmp.lt.u32.totalorder %s909_s7, %s1263_s14 }
 0x2a7   : > { %p911_p10 = pnand %p910_p9, %p1335_p0 }
 0x2a8   : > { %p916_p1 = por %p915_p6, %p914_p8 }
 0x2a9   : > { %p912_p11 = pneg %p911_p10 }
 0x2aa   : > { %p918_p5 = por %p917_p4, %p916_p1 }
 0x2ac   : > { %p919_p12 = pnand %p918_p5, %p912_p11 }
 0x2ae   : > { %922 = shalt.err (!%p919_p12)
}
 0x2af   : > { %s978_s22 = smov 128   ;;  %s979_s26 = smov 8  }
 0x2b0   : > { %739 = dma.vmem_to_hbm [thread:$0]  (%p1335_p0), %s1258_s30, 512, %s1263_s14, %s493_s8, %s978_s22, %s978_s22, %s979_s26  }
 0x2b1 PF: > { %p759_p2 = scmp.ge.s32.totalorder %s969_s18, 2  ;;  %s521_s23 = sand.u32 1, %s957_s15  }
 0x2b2   : > { %p1336_p3 = scmp.ne.s32.totalorder %s1322_s28, 0  ;;  %s522_s20 = scalar_lea.sflag [#allocation4], %s521_s23 }
 0x2b4   : > { %p753_p13 = pnand %p759_p2, %p1336_p3 }
 0x2b6   : > { %952 = dma.done.wait (!%p753_p13), %s522_s20, 512  }
 0x2b7   : > { %954 = vsyncadd (!%p753_p13), %s522_s20, 4294966784  ;;  %s1337_s11 = sld [smem:[#allocation13_spill]]  ;;  %p20_p7 = scmp.ge.s32.totalorder %s1030_s21, 6  }
 0x2b8   : > { %s1338_s15 = smov %s961_s16  ;;  %s1339_s16 = smov %s965_s17 }
 0x2b9   : > { %s1341_s18 = smov %s1030_s21  ;;  %22 = sbr.rel (!%p20_p7) target bundleno = 10 (0xa), region = 98 }
 0x2bd   : > { %s1340_s17 = smov %s1337_s11 }
 0x2c0   :  { %527 = vsyncpa [#allocation3], 1 }
 0x2c1   :  { %529 = vsyncpa [#allocation3 + $0x1], 1 }
 0x2c2   :  { %530 = vsyncpa [#allocation6], 1 }
 0x2c3   :  { %532 = vsyncpa [#allocation6 + $0x1], 1 }
 0x2c4   :  { %533 = vsyncpa [#allocation4], 1 }
 0x2c5   :  { %535 = vsyncpa [#allocation4 + $0x1], 1 }

</bundles_post_ra>
